<compile_context>
chip_gen: v6e
topology: v6e:2x2x1
jax: 0.10.0
libtpu: 0.0.40
codegen_flags: <defaults>
</compile_context>

<pallas_src>
import jax
import jax.numpy as jnp
from jax.experimental import pallas as pl
from jax.experimental.pallas import tpu as pltpu


def gcn_kernel(adji_ref, feat_ref, w0_ref, b0x2_ref, w1_ref, b1x2_ref,
               out_ref, mask_ref):
    BT, N, _ = adji_ref.shape
    in_dim = feat_ref.shape[-1]
    mem_dim = w0_ref.shape[-1]

    # (A + I) arrives as bf16 (exact for 0/1 adjacency + identity). Cast once;
    # the f32 tile is reused by both reductions and both layers' einsums.
    a = adji_ref[...].astype(jnp.float32)                 # (BT, N, N)

    # Row / col sums of (A + I), lane layout -> lane-dense (BT, 1, N) mask store.
    row_sum = jnp.sum(a, axis=2)                          # (BT, N) == adj.sum(2) + 1
    col_sum = jnp.sum(a, axis=1)                          # (BT, N) == adj.sum(1) + 1
    # reference mask: (adj.sum(2) + adj.sum(1)) == 0  <=>  row_sum + col_sum == 2
    mask_ref[...] = ((row_sum + col_sum) == 2.0)[:, None, :]

    # Shared denominator for both layers; row_sum(A+I) IS adj.sum(2)+1. One reciprocal.
    inv_denom = 1.0 / row_sum[:, :, None]                 # (BT, N, 1)

    feat = feat_ref[...]
    w0 = w0_ref[...]
    w1 = w1_ref[...]
    b0x2 = b0x2_ref[...]                                  # host-side pre-doubled biases
    b1x2 = b1x2_ref[...]

    def linear(x3, w):
        # Shared-weight matmul on the flattened (BT*N, D) slab when the reshape is a
        # layout-preserving view (N multiple of 8); otherwise per-graph einsum.
        if N % 8 == 0:
            y = jnp.dot(x3.reshape(BT * N, x3.shape[-1]), w,
                        preferred_element_type=jnp.float32)
            return y.reshape(BT, N, w.shape[-1])
        return jnp.einsum("bnd,de->bne", x3, w, preferred_element_type=jnp.float32)

    # ---- layer 0:  ((A+I)·X)·W0 + 2·b0  ==  (A·X)·W0 + b0 + X·W0 + b0 ----
    if in_dim > mem_dim:
        # associativity: (A+I)·(X·W0) — batched-einsum operand width drops to mem_dim
        h = jnp.einsum("bij,bjd->bid", a, linear(feat, w0),
                       preferred_element_type=jnp.float32) + b0x2
    else:
        h = linear(jnp.einsum("bij,bjd->bid", a, feat,
                              preferred_element_type=jnp.float32), w0) + b0x2
    h = h * inv_denom                                      # dropout (eval) == identity

    # ---- layer 1 ----
    out = linear(jnp.einsum("bij,bjd->bid", a, h,
                            preferred_element_type=jnp.float32), w1) + b1x2
    out_ref[...] = (out * inv_denom).astype(out_ref.dtype)


def _vmem_capacity_bytes():
    try:
        return int(pltpu.get_tpu_info().vmem_capacity_bytes)
    except Exception:
        return 64 << 20            # conservative fallback: v7x per-TC VMEM


def _per_graph_bytes(N, in_dim, mem_dim):
    """Per-graph per-step VMEM footprint: double-buffered I/O blocks plus the
    in-kernel f32 temporaries (f32 adj copy, ah / h / out intermediates)."""
    dmax = max(in_dim, mem_dim)
    io_blocks = 2 * (2 * N * N + 4 * N * in_dim + 4 * N * mem_dim + N)
    temporaries = 4 * N * N + 12 * N * dmax
    return io_blocks + temporaries


def _pick_block_batch(B, N, in_dim, mem_dim, vmem_cap):
    """Largest divisor of B whose per-step footprint fits ~VMEM/8, preferring an
    even number of grid steps (v7x shards the parallel axis over 2 TensorCores)."""
    per_graph = _per_graph_bytes(N, in_dim, mem_dim)
    budget = max(vmem_cap // 8, 2 << 20)
    cap = max(1, min(B, budget // max(per_graph, 1)))
    divisors = [d for d in range(1, B + 1) if B % d == 0 and d <= cap]
    even_steps = [d for d in divisors if (B // d) % 2 == 0]
    return max(even_steps) if even_steps else max(divisors)


def gcn_forward(adj, feature, w0, b0, w1, b1, *, block_batch=None):
    B, N, _ = adj.shape
    in_dim = feature.shape[-1]
    mem_dim = w0.shape[-1]

    vmem_cap = _vmem_capacity_bytes()
    bt = block_batch or _pick_block_batch(B, N, in_dim, mem_dim, vmem_cap)
    assert B % bt == 0

    # Fold the identity into the adjacency on the host. bf16 is exact for the
    # 0/1 (or 2, on a self-loop diagonal) entries of A+I and halves the dominant
    # HBM stream.  NOTE: only valid for small-integer (unweighted) adjacencies.
    eye = jnp.eye(N, dtype=adj.dtype)
    adj_plus_i = (adj + eye).astype(jnp.bfloat16)

    # Pre-double the biases (the fold needs 2·b) — keeps a per-step VPU mul out of the kernel.
    b0x2 = (2.0 * b0).reshape(1, mem_dim)
    b1x2 = (2.0 * b1).reshape(1, mem_dim)

    per_graph = _per_graph_bytes(N, in_dim, mem_dim)
    weight_bytes = 2 * 4 * (in_dim * mem_dim + mem_dim * mem_dim + 2 * mem_dim)
    need = bt * per_graph + weight_bytes + (2 << 20)           # + compiler scratch slack
    # Clamp to ~5/8 of physical VMEM: ≈40 MiB on v7x (64 MiB), ≈80 MiB on v5e/v6e (128 MiB).
    vmem_limit = int(min(max(need, 32 << 20), (vmem_cap * 5) // 8))

    out_feat, mask = pl.pallas_call(
        gcn_kernel,
        out_shape=(
            jax.ShapeDtypeStruct((B, N, mem_dim), jnp.float32),
            jax.ShapeDtypeStruct((B, 1, N), jnp.bool_),
        ),
        grid_spec=pltpu.PrefetchScalarGridSpec(
            num_scalar_prefetch=0,
            grid=(B // bt,),
            in_specs=[
                pl.BlockSpec((bt, N, N), lambda b: (b, 0, 0)),
                pl.BlockSpec((bt, N, in_dim), lambda b: (b, 0, 0)),
                # Constant index_map -> weight/bias blocks stay VMEM-resident
                # across grid steps (no per-step re-DMA).
                pl.BlockSpec((in_dim, mem_dim), lambda b: (0, 0)),
                pl.BlockSpec((1, mem_dim), lambda b: (0, 0)),
                pl.BlockSpec((mem_dim, mem_dim), lambda b: (0, 0)),
                pl.BlockSpec((1, mem_dim), lambda b: (0, 0)),
            ],
            out_specs=(
                pl.BlockSpec((bt, N, mem_dim), lambda b: (b, 0, 0)),
                pl.BlockSpec((bt, 1, N), lambda b: (b, 0, 0)),
            ),
        ),
        compiler_params=pltpu.CompilerParams(
            dimension_semantics=("parallel",),
            vmem_limit_bytes=vmem_limit),
    )(adj_plus_i, feature, w0, b0x2, w1, b1x2)

    # Lane-dense (B, 1, N) mask -> the module's (B, N, 1) layout (free reshape in XLA).
    return out_feat, mask.reshape(B, N, 1)


def gcn_reference(adj, feature, w0, b0, w1, b1):
    """Pure-JAX reference mirroring the PyTorch forward (eval mode)."""
    denom = jnp.sum(adj, axis=2, keepdims=True) + 1.0
    mask = ((jnp.sum(adj, axis=2) + jnp.sum(adj, axis=1)) == 0)[..., None]
    h = feature
    for (w, b) in ((w0, b0), (w1, b1)):
        ax = jnp.einsum("bij,bjd->bid", adj, h)
        axw = ax @ w + b
        axw = axw + (h @ w + b)
        h = axw / denom
    return h, mask


if __name__ == "__main__":
    # Small shapes consistent with the module: B graphs, N nodes,
    # in_dim input features, mem_dim hidden size, num_layers = 2.
    B, N, in_dim, mem_dim = 8, 16, 32, 32

    key = jax.random.PRNGKey(0)
    k_adj, k_feat, k_w0, k_b0, k_w1, k_b1 = jax.random.split(key, 6)

    # Random 0/1 adjacency (some rows/cols fully zero so the mask is exercised).
    adj = (jax.random.uniform(k_adj, (B, N, N)) > 0.7).astype(jnp.float32)
    adj = adj.at[:, N - 2:, :].set(0.0).at[:, :, N - 2:].set(0.0)
    feature = jax.random.normal(k_feat, (B, N, in_dim), dtype=jnp.float32)

    # Deterministic Linear init (PyTorch-style uniform(-1/sqrt(fan_in), +)).
    bound0 = 1.0 / (in_dim ** 0.5)
    bound1 = 1.0 / (mem_dim ** 0.5)
    w0 = jax.random.uniform(k_w0, (in_dim, mem_dim), jnp.float32, -bound0, bound0)
    b0 = jax.random.uniform(k_b0, (1, mem_dim), jnp.float32, -bound0, bound0)
    w1 = jax.random.uniform(k_w1, (mem_dim, mem_dim), jnp.float32, -bound1, bound1)
    b1 = jax.random.uniform(k_b1, (1, mem_dim), jnp.float32, -bound1, bound1)

    out_feat, mask = jax.block_until_ready(
        gcn_forward(adj, feature, w0, b0, w1, b1))

    ref_feat, ref_mask = gcn_reference(adj, feature, w0, b0, w1, b1)
    assert out_feat.shape == (B, N, mem_dim) and out_feat.dtype == jnp.float32
    assert mask.shape == (B, N, 1) and mask.dtype == jnp.bool_
    assert jnp.allclose(out_feat, ref_feat, atol=1e-4, rtol=1e-4)
    assert jnp.array_equal(mask, ref_mask)

    print("KERNEL_OK")
</pallas_src>

<mosaic_0001>
module attributes {stable_mosaic.version = 11 : i64} {
  func.func @gcn_kernel(%arg0: i32, %arg1: memref<4x16x16xbf16, #tpu.memory_space<vmem>>, %arg2: memref<4x16x32xf32, #tpu.memory_space<vmem>>, %arg3: memref<32x32xf32, #tpu.memory_space<vmem>>, %arg4: memref<1x32xf32, #tpu.memory_space<vmem>>, %arg5: memref<32x32xf32, #tpu.memory_space<vmem>>, %arg6: memref<1x32xf32, #tpu.memory_space<vmem>>, %arg7: memref<4x16x32xf32, #tpu.memory_space<vmem>>, %arg8: memref<4x1x16xi32, #tpu.memory_space<vmem>>) attributes {dimension_semantics = [#tpu.dimension_semantics<parallel>], iteration_bounds = array<i64: 2>, scalar_prefetch = 0 : i64, scratch_operands = 0 : i64, tpu.core_type = #tpu.core_type<tc>, window_params = [{transform_indices = @transform_0, window_bounds = array<i64: 4, 16, 16>}, {transform_indices = @transform_1, window_bounds = array<i64: 4, 16, 32>}, {pipeline_mode = #tpu.pipeline_mode<synchronous>, transform_indices = @transform_2, window_bounds = array<i64: 32, 32>}, {pipeline_mode = #tpu.pipeline_mode<synchronous>, transform_indices = @transform_3, window_bounds = array<i64: 1, 32>}, {pipeline_mode = #tpu.pipeline_mode<synchronous>, transform_indices = @transform_4, window_bounds = array<i64: 32, 32>}, {pipeline_mode = #tpu.pipeline_mode<synchronous>, transform_indices = @transform_5, window_bounds = array<i64: 1, 32>}, {transform_indices = @transform_6, window_bounds = array<i64: 4, 16, 32>}, {transform_indices = @transform_7, window_bounds = array<i64: 4, 1, 16>}]} {
    %c0 = arith.constant 0 : index
    %c0_0 = arith.constant 0 : index
    %c0_1 = arith.constant 0 : index
    %0 = vector.load %arg1[%c0, %c0_0, %c0_1] : memref<4x16x16xbf16, #tpu.memory_space<vmem>>, vector<4x16x16xbf16>
    %1 = arith.extf %0 : vector<4x16x16xbf16> to vector<4x16x16xf32>
    %cst = arith.constant dense<0.000000e+00> : vector<4x16xf32>
    %2 = vector.multi_reduction <add>, %1, %cst [2] : vector<4x16x16xf32> to vector<4x16xf32>
    %cst_2 = arith.constant dense<0.000000e+00> : vector<4x16xf32>
    %3 = vector.multi_reduction <add>, %1, %cst_2 [1] : vector<4x16x16xf32> to vector<4x16xf32>
    %4 = arith.addf %2, %3 : vector<4x16xf32>
    %cst_3 = arith.constant 2.000000e+00 : f32
    %5 = vector.broadcast %cst_3 : f32 to vector<4x16xf32>
    %6 = arith.cmpf oeq, %4, %5 : vector<4x16xf32>
    %7 = vector.shape_cast %6 : vector<4x16xi1> to vector<4x1x16xi1>
    %c0_4 = arith.constant 0 : index
    %c0_5 = arith.constant 0 : index
    %c0_6 = arith.constant 0 : index
    %8 = vector.load %arg8[%c0_4, %c0_5, %c0_6] : memref<4x1x16xi32, #tpu.memory_space<vmem>>, vector<4x1x16xi32>
    %9 = arith.extui %7 : vector<4x1x16xi1> to vector<4x1x16xi32>
    %cst_7 = arith.constant dense<0> : vector<4x1x16xi32>
    %10 = arith.cmpi ne, %8, %cst_7 : vector<4x1x16xi32>
    tpu.vector_store %arg8[%c0_4, %c0_5, %c0_6], %9 {strides = array<i32>} : memref<4x1x16xi32, #tpu.memory_space<vmem>>, vector<4x1x16xi32>,
    %11 = vector.shape_cast %2 : vector<4x16xf32> to vector<4x16x1xf32>
    %cst_8 = arith.constant 1.000000e+00 : f32
    %12 = vector.broadcast %cst_8 : f32 to vector<4x16x1xf32>
    %13 = arith.divf %12, %11 : vector<4x16x1xf32>
    %c0_9 = arith.constant 0 : index
    %c0_10 = arith.constant 0 : index
    %c0_11 = arith.constant 0 : index
    %14 = vector.load %arg2[%c0_9, %c0_10, %c0_11] : memref<4x16x32xf32, #tpu.memory_space<vmem>>, vector<4x16x32xf32>
    %c0_12 = arith.constant 0 : index
    %c0_13 = arith.constant 0 : index
    %15 = vector.load %arg3[%c0_12, %c0_13] : memref<32x32xf32, #tpu.memory_space<vmem>>, vector<32x32xf32>
    %c0_14 = arith.constant 0 : index
    %c0_15 = arith.constant 0 : index
    %16 = vector.load %arg5[%c0_14, %c0_15] : memref<32x32xf32, #tpu.memory_space<vmem>>, vector<32x32xf32>
    %c0_16 = arith.constant 0 : index
    %c0_17 = arith.constant 0 : index
    %17 = vector.load %arg4[%c0_16, %c0_17] : memref<1x32xf32, #tpu.memory_space<vmem>>, vector<1x32xf32>
    %c0_18 = arith.constant 0 : index
    %c0_19 = arith.constant 0 : index
    %18 = vector.load %arg6[%c0_18, %c0_19] : memref<1x32xf32, #tpu.memory_space<vmem>>, vector<1x32xf32>
    "tpu.trace_start"() <{level = 10 : i32, message = "bij,bjd->bid"}> : () -> ()
    %cst_20 = arith.constant dense<0.000000e+00> : vector<4x16x32xf32>
    %19 = tpu.matmul %1, %14, %cst_20 {dimension_numbers = #tpu.dot_dimension_numbers<[2], [1], [1], [2], [0, 0, 0, 1, 1, 2], [0], [0]>} : vector<4x16x16xf32>, vector<4x16x32xf32>, vector<4x16x32xf32> -> vector<4x16x32xf32>
    "tpu.trace_stop"() : () -> ()
    %20 = vector.shape_cast %19 : vector<4x16x32xf32> to vector<64x32xf32>
    %cst_21 = arith.constant dense<0.000000e+00> : vector<64x32xf32>
    %21 = tpu.matmul %20, %15, %cst_21 {dimension_numbers = #tpu.dot_dimension_numbers<[1], [0], [0], [1], [0, 0, 1, 1], [], []>} : vector<64x32xf32>, vector<32x32xf32>, vector<64x32xf32> -> vector<64x32xf32>
    %22 = vector.shape_cast %21 : vector<64x32xf32> to vector<4x16x32xf32>
    %23 = vector.shape_cast %17 : vector<1x32xf32> to vector<1x1x32xf32>
    %24 = vector.broadcast %23 : vector<1x1x32xf32> to vector<4x16x32xf32>
    %25 = arith.addf %22, %24 : vector<4x16x32xf32>
    %26 = vector.broadcast %13 : vector<4x16x1xf32> to vector<4x16x32xf32>
    %27 = arith.mulf %25, %26 : vector<4x16x32xf32>
    "tpu.trace_start"() <{level = 10 : i32, message = "bij,bjd->bid"}> : () -> ()
    %cst_22 = arith.constant dense<0.000000e+00> : vector<4x16x32xf32>
    %28 = tpu.matmul %1, %27, %cst_22 {dimension_numbers = #tpu.dot_dimension_numbers<[2], [1], [1], [2], [0, 0, 0, 1, 1, 2], [0], [0]>} : vector<4x16x16xf32>, vector<4x16x32xf32>, vector<4x16x32xf32> -> vector<4x16x32xf32>
    "tpu.trace_stop"() : () -> ()
    %29 = vector.shape_cast %28 : vector<4x16x32xf32> to vector<64x32xf32>
    %cst_23 = arith.constant dense<0.000000e+00> : vector<64x32xf32>
    %30 = tpu.matmul %29, %16, %cst_23 {dimension_numbers = #tpu.dot_dimension_numbers<[1], [0], [0], [1], [0, 0, 1, 1], [], []>} : vector<64x32xf32>, vector<32x32xf32>, vector<64x32xf32> -> vector<64x32xf32>
    %31 = vector.shape_cast %30 : vector<64x32xf32> to vector<4x16x32xf32>
    %32 = vector.shape_cast %18 : vector<1x32xf32> to vector<1x1x32xf32>
    %33 = vector.broadcast %32 : vector<1x1x32xf32> to vector<4x16x32xf32>
    %34 = arith.addf %31, %33 : vector<4x16x32xf32>
    %35 = vector.broadcast %13 : vector<4x16x1xf32> to vector<4x16x32xf32>
    %36 = arith.mulf %34, %35 : vector<4x16x32xf32>
    %c0_24 = arith.constant 0 : index
    %c0_25 = arith.constant 0 : index
    %c0_26 = arith.constant 0 : index
    %37 = vector.load %arg7[%c0_24, %c0_25, %c0_26] : memref<4x16x32xf32, #tpu.memory_space<vmem>>, vector<4x16x32xf32>
    tpu.vector_store %arg7[%c0_24, %c0_25, %c0_26], %36 {strides = array<i32>} : memref<4x16x32xf32, #tpu.memory_space<vmem>>, vector<4x16x32xf32>,
    return
  }
  func.func @transform_0(%arg0: i32) -> (i32, i32, i32) {
    %c0_i32 = arith.constant 0 : i32
    %c0_i32_0 = arith.constant 0 : i32
    %c0_i32_1 = arith.constant 0 : i32
    return %arg0, %c0_i32, %c0_i32_0 : i32, i32, i32
  }
  func.func @transform_1(%arg0: i32) -> (i32, i32, i32) {
    %c0_i32 = arith.constant 0 : i32
    %c0_i32_0 = arith.constant 0 : i32
    %c0_i32_1 = arith.constant 0 : i32
    return %arg0, %c0_i32, %c0_i32_0 : i32, i32, i32
  }
  func.func @transform_2(%arg0: i32) -> (i32, i32) {
    %c0_i32 = arith.constant 0 : i32
    %c0_i32_0 = arith.constant 0 : i32
    %c0_i32_1 = arith.constant 0 : i32
    return %c0_i32, %c0_i32_0 : i32, i32
  }
  func.func @transform_3(%arg0: i32) -> (i32, i32) {
    %c0_i32 = arith.constant 0 : i32
    %c0_i32_0 = arith.constant 0 : i32
    %c0_i32_1 = arith.constant 0 : i32
    return %c0_i32, %c0_i32_0 : i32, i32
  }
  func.func @transform_4(%arg0: i32) -> (i32, i32) {
    %c0_i32 = arith.constant 0 : i32
    %c0_i32_0 = arith.constant 0 : i32
    %c0_i32_1 = arith.constant 0 : i32
    return %c0_i32, %c0_i32_0 : i32, i32
  }
  func.func @transform_5(%arg0: i32) -> (i32, i32) {
    %c0_i32 = arith.constant 0 : i32
    %c0_i32_0 = arith.constant 0 : i32
    %c0_i32_1 = arith.constant 0 : i32
    return %c0_i32, %c0_i32_0 : i32, i32
  }
  func.func @transform_6(%arg0: i32) -> (i32, i32, i32) {
    %c0_i32 = arith.constant 0 : i32
    %c0_i32_0 = arith.constant 0 : i32
    %c0_i32_1 = arith.constant 0 : i32
    return %arg0, %c0_i32, %c0_i32_0 : i32, i32, i32
  }
  func.func @transform_7(%arg0: i32) -> (i32, i32, i32) {
    %c0_i32 = arith.constant 0 : i32
    %c0_i32_0 = arith.constant 0 : i32
    %c0_i32_1 = arith.constant 0 : i32
    return %arg0, %c0_i32, %c0_i32_0 : i32, i32, i32
  }
}

</mosaic_0001>

<bundles_post_ra>
// kernel: tpu_custom_call.1
= control target key start
LH: loop header
LB: loop body
LE: loop exit
PB: predicated region body
PF: predicated region fallthrough
CT: control target
= control target key end

     0   :  { %s2748_s0 = inlined_call_operand.hbm [shape: bf16[8,16,16], index: 0, kind: input, shape index: {}]   ;;  %s2749_s1 = inlined_call_operand.hbm [shape: f32[8,16,32], index: 1, kind: input, shape index: {}]   ;;  %s2750_s2 = inlined_call_operand.hbm [shape: f32[32,32], index: 2, kind: input, shape index: {}]   ;;  %s2751_s3 = inlined_call_operand.vmem [shape: f32[1,32], index: 3, kind: input, shape index: {}]   ;;  %s2752_s4 = inlined_call_operand.hbm [shape: f32[32,32], index: 4, kind: input, shape index: {}]   ;;  %s2753_s5 = inlined_call_operand.vmem [shape: f32[1,32], index: 5, kind: input, shape index: {}]   ;;  %s2754_s6 = inlined_call_operand.hbm [shape: f32[8,16,32], index: 6, kind: output, shape index: {0}]   ;;  %s2755_s7 = inlined_call_operand.vmem [shape: s32[8,1,16], index: 7, kind: output, shape index: {1}]  }
   0x1   :  { %2762 = sst [smem:[#allocation18_spill]] %s2748_s0 }
   0x2   :  { %2763 = sst [smem:[#allocation19_spill]] %s2750_s2 }
   0x3   :  { %2764 = sst [smem:[#allocation20_spill]] %s2752_s4 }
   0x4   :  { %13 = vsyncpa [#allocation3], 0 }
   0x5   :  { %15 = vsyncpa [#allocation3 + $0x1], 0 }
   0x6   :  { %16 = vsyncpa [#allocation6], 0 }
   0x7   :  { %18 = vsyncpa [#allocation6 + $0x1], 0 }
   0x8   :  { %19 = vsyncpa [#allocation9], 0 }
   0x9   :  { %20 = vsyncpa [#allocation4], 0 }
   0xa   :  { %22 = vsyncpa [#allocation4 + $0x1], 0  ;;  %s2292_s24 = smov 0   ;;  %s2294_s25 = smov 0  }
   0xb   :  { %s2296_s26 = smov 0   ;;  %s2298_s27 = smov 0  }
   0xc LB: > { %2765 = sst [smem:[#allocation16_spill]] %s2234_s26  ;;  %s2313_s28 = sadd.s32 4294967295, %s2238_s27   ;;  %s2238_s27 = sphi %s2298_s27, %s2792_s27   ;;  %s2234_s26 = sphi %s2296_s26, %s2789_s26   ;;  %s2230_s25 = sphi %s2294_s25, %s2791_s25   ;;  %s2226_s24 = sphi %s2292_s24, %s2790_s24  }
   0xd   : > { %s1712_s29 = sadd.s32 4294967294, %s2238_s27   ;;  %p48_p0 = scmp.ne.s32.totalorder %s2230_s25, %s2226_s24 }
   0xe   : > { %p2758_p1 = scmp.eq.s32.totalorder %s2313_s28, 0  ;;  %p182_p2 = scmp.eq.s32.totalorder %s2313_s28, 1 }
   0xf   : > { %p188_p3 = scmp.eq.s32.totalorder %s1712_s29, 1  ;;  %p1713_p5 = scmp.ge.s32.totalorder %s2238_s27, 1 }
  0x10   : > { %p2322_p4 = por %p2758_p1, %p48_p0  ;;  %p221_p7 = scmp.lt.s32.totalorder %s2238_s27, 3 }
  0x11   : > { %p2327_p6 = por %p188_p3, %p48_p0  ;;  %s2240_s10 = smov [#allocation7]  }
  0x12   : > { %s2766_s30 = scalar_select %p2322_p4, 1, 0 }
  0x13   : > { %s2767_s8 = scalar_select %p2327_p6, 1, 0 }
  0x14   : > { %p2332_p8 = pnand %p1713_p5, %p221_p7  ;;  %s233_s11 = sshll.u32 %s2240_s10, 4  ;;  %s234_s11 = int_to_ptr.vmem [resolvable:$true] %s233_s11 }
  0x15   : > { %s2241_s13 = smov [#allocation8]   ;;  %s2065_s15 = scalar_lea.vmem %s234_s11, 512 }
  0x16   : > { %p1971_p9 = pneg %p2332_p8  ;;  %s249_s14 = sshll.u32 %s2241_s13, 4  ;;  %s250_s14 = int_to_ptr.vmem [resolvable:$true] %s249_s14 }
  0x17   : > { %p2066_p13 = scmp.ne.s32.totalorder %s234_s11, %s2065_s15  ;;  %p2073_p5 = scmp.lt.s32.totalorder %s234_s11, %s234_s11 }
  0x18   : > { %p2341_p11 = pnand %p1971_p9, %p2758_p1  ;;  %p2074_p7 = scmp.lt.s32.totalorder %s2065_s15, %s2065_s15 }
  0x1a   : > { %p2056_p12 = pneg %p2341_p11  ;;  %p2075_p10 = por %p2074_p7, %p2073_p5 }
  0x1c   : > { %p2068_p0 = pnand %p2066_p13, %p2056_p12 }
  0x1e   : > { %p2069_p3 = pneg %p2068_p0 }
  0x20   : > { %p2076_p9 = pnand %p2075_p10, %p2069_p3 }
  0x22   : > { %2079 = shalt.err (!%p2076_p9)
}
  0x23   : > { %s2756_s16 = smov 128   ;;  %s2757_s17 = smov 8  }
  0x24   : > { %s2770_s2 = sld [smem:[#allocation19_spill]]  ;;  %s2091_s20 = scalar_lea.vmem %s250_s14, 512 }
  0x25   : > { %p2092_p13 = scmp.ne.s32.totalorder %s250_s14, %s2091_s20  ;;  %p2099_p10 = scmp.lt.s32.totalorder %s250_s14, %s250_s14 }
  0x26   : > { %p2100_p3 = scmp.lt.s32.totalorder %s2091_s20, %s2091_s20 }
  0x27   : > { %p2094_p0 = pnand %p2092_p13, %p2056_p12 }
  0x28   : > { %p2101_p7 = por %p2100_p3, %p2099_p10 }
  0x29   : > { %p2095_p5 = pneg %p2094_p0 }
  0x2a   : > { %1974 = dma.hbm_to_vmem [thread:$0]  (!%p2341_p11), %s2770_s2, 512, %s234_s11, [#allocation6], %s2756_s16, %s2756_s16, %s2757_s17  }
  0x2b   : > { %p2102_p9 = pnand %p2101_p7, %p2095_p5 }
  0x2d   : > { %2105 = shalt.err (!%p2102_p9)
}
  0x2e   : > { %s2771_s4 = sld [smem:[#allocation20_spill]]  ;;  %s2370_s23 = sadd.s32 1, %s2238_s27  }
  0x2f   : > { %s35_s29 = sadd.s32 1, %s2234_s26  ;;  %s32_s10 = ssub.s32 %s2238_s27, %s2370_s23 }
  0x30   : > { %p42_p12 = scmp.ne.s32.totalorder %s2234_s26, %s2230_s25  ;;  %p33_p13 = scmp.eq.s32.totalorder %s32_s10, 0 }
  0x31   : > { %p43_p0 = scmp.eq.s32.totalorder %s2238_s27, 0  ;;  %p1991_p10 = scmp.lt.s32.totalorder %s2238_s27, 2 }
  0x32   : > { %p2380_p5 = por %p182_p2, %p42_p12  ;;  %s2389_s13 = sand.u32 1, %s2234_s26  }
  0x33   : > { %s2386_s12 = scalar_select %p33_p13, %s2234_s26, %s35_s29  }
  0x34   : > { %1977 = dma.hbm_to_vmem [thread:$0]  (!%p2341_p11), %s2771_s4, 512, %s250_s14, [#allocation9], %s2756_s16, %s2756_s16, %s2757_s17  }
  0x35   : > { %s2772_s11 = scalar_select %p2380_p5, 1, 0 }
  0x36   : > { %2773 = sst [smem:[#allocation17_spill]] %s2386_s12  ;;  %p44_p3 = por %p43_p0, %p42_p12 }
  0x37   : > { %s1717_s14 = sshll.u32 %s2389_s13, 5  ;;  %s1773_s15 = sshll.u32 %s2238_s27, 9 }
  0x38   : > { %s2774_s0 = sld [smem:[#allocation18_spill]]  ;;  %s270_s21 = scalar_lea.vmem [#allocation2], %s1717_s14 }
  0x39   : > { %s278_s22 = sshll.u32 %s270_s21, 4  ;;  %p2400_p2 = pnand %p1991_p10, %p44_p3  ;;  %s2398_s22 = int_to_ptr.vmem [resolvable:$true] %s278_s22 }
  0x3b   : > { %p2108_p7 = pneg %p2400_p2 }
  0x3e   : > { %s2396_s20 = scalar_lea.hbm %s2774_s0, %s1773_s15  ;;  %s2111_s18 = scalar_lea.hbm %s2774_s0, 1024 }
  0x3f   : > { %s2106_s17 = scalar_lea.hbm %s2396_s20, 512  ;;  %p2112_p13 = scmp.lt.s32.totalorder %s2396_s20, %s2774_s0 }
  0x40   : > { %p2107_p11 = scmp.ne.s32.totalorder %s2396_s20, %s2106_s17  ;;  %p2113_p0 = scmp.lt.s32.totalorder %s2111_s18, %s2106_s17 }
  0x42   : > { %p2109_p9 = pnand %p2108_p7, %p2107_p11  ;;  %p2114_p10 = por %p2113_p0, %p2112_p13 }
  0x44   : > { %p2110_p12 = pneg %p2109_p9 }
  0x46   : > { %p2115_p3 = pnand %p2114_p10, %p2110_p12 }
  0x48   : > { %2118 = shalt.err (!%p2115_p3)
}
  0x49   : > { %s2119_s10 = scalar_lea.vmem %s2398_s22, 512  ;;  %s2244_s14 = smov [#allocation2]  }
  0x4a   : > { %p2120_p1 = scmp.ne.s32.totalorder %s2398_s22, %s2119_s10  ;;  %s2124_s15 = sshll.u32 %s2244_s14, 4  ;;  %s2125_s15 = int_to_ptr.vmem [resolvable:$false] %s2124_s15 }
  0x4b   : > { %s2126_s16 = scalar_lea.vmem %s2125_s15, 1024  ;;  %p2127_p6 = scmp.lt.s32.totalorder %s2398_s22, %s2125_s15 }
  0x4c   : > { %p2122_p11 = pnand %p2120_p1, %p2108_p7  ;;  %p2128_p5 = scmp.lt.s32.totalorder %s2126_s16, %s2119_s10 }
  0x4e   : > { %p2123_p9 = pneg %p2122_p11  ;;  %p2129_p4 = por %p2128_p5, %p2127_p6 }
  0x50   : > { %p2130_p13 = pnand %p2129_p4, %p2123_p9 }
  0x52   : > { %2133 = shalt.err (!%p2130_p13)
}
  0x53   : > { %s2245_s17 = smov 64   ;;  %s2246_s18 = smov 4  }
  0x54   : > { %s2776_s19 = scalar_lea.sflag [#allocation3], %s2389_s13  ;;  %s1721_s21 = sshll.u32 %s2389_s13, 6 }
  0x55   : > { %1981 = dma.hbm_to_vmem [thread:$0]  (!%p2400_p2), %s2396_s20, 512, %s2398_s22, %s2776_s19, %s2245_s17, %s2245_s17, %s2246_s18  }
  0x56   : > { %s1775_s14 = sshll.u32 %s2238_s27, 10  ;;  %s292_s0 = scalar_lea.vmem [#allocation5], %s1721_s21 }
  0x57   : > { %s2437_s10 = scalar_lea.hbm %s2749_s1, %s1775_s14  ;;  %s300_s2 = sshll.u32 %s292_s0, 4  ;;  %s2439_s2 = int_to_ptr.vmem [resolvable:$true] %s300_s2 }
  0x58   : > { %s2777_s4 = sand.u32 1, %s2238_s27   ;;  %s2134_s26 = scalar_lea.hbm %s2437_s10, 1024 }
  0x59   : > { %s289_s12 = scalar_lea.sflag [#allocation6], %s2777_s4  ;;  %p2135_p1 = scmp.ne.s32.totalorder %s2437_s10, %s2134_s26 }
  0x5a   : > { %s2139_s22 = scalar_lea.hbm %s2749_s1, 2048  ;;  %p2140_p5 = scmp.lt.s32.totalorder %s2437_s10, %s2749_s1 }
  0x5b   : > { %p2137_p4 = pnand %p2135_p1, %p2108_p7  ;;  %p2141_p12 = scmp.lt.s32.totalorder %s2139_s22, %s2134_s26 }
  0x5d   : > { %p2138_p6 = pneg %p2137_p4  ;;  %p2142_p0 = por %p2141_p12, %p2140_p5 }
  0x5f   : > { %p2143_p10 = pnand %p2142_p0, %p2138_p6 }
  0x61   : > { %2146 = shalt.err (!%p2143_p10)
}
  0x62   : > { %s2147_s0 = scalar_lea.vmem %s2439_s2, 1024  ;;  %s2247_s4 = smov [#allocation5]  }
  0x63   : > { %p2148_p3 = scmp.ne.s32.totalorder %s2439_s2, %s2147_s0  ;;  %s2152_s19 = sshll.u32 %s2247_s4, 4  ;;  %s2153_s19 = int_to_ptr.vmem [resolvable:$false] %s2152_s19 }
  0x64   : > { %s2154_s21 = scalar_lea.vmem %s2153_s19, 2048  ;;  %p2155_p13 = scmp.lt.s32.totalorder %s2439_s2, %s2153_s19 }
  0x65   : > { %p2150_p11 = pnand %p2148_p3, %p2108_p7  ;;  %p2156_p1 = scmp.lt.s32.totalorder %s2154_s21, %s2147_s0 }
  0x67   : > { %p2151_p9 = pneg %p2150_p11  ;;  %p2157_p4 = por %p2156_p1, %p2155_p13 }
  0x69   : > { %p2158_p5 = pnand %p2157_p4, %p2151_p9 }
  0x6b   : > { %2161 = shalt.err (!%p2158_p5)
}
  0x6c   : > { %s2778_s26 = smov 8   ;;  %s2779_s14 = smov 128  }
  0x6d   : > { %1984 = dma.hbm_to_vmem [thread:$0]  (!%p2400_p2), %s2437_s10, 1024, %s2439_s2, %s289_s12, %s2779_s14, %s2779_s14, %s2778_s26  }
  0x6e   : > { %312 = sbr.rel (%p2332_p8) target bundleno = 949 (0x3b5), region = 44  ;;  %s2471_s15 = sand.u32 (!%p2332_p8), 1, %s2230_s25  }
  0x6f   : > { %s1726_s16 = sshll.u32 (!%p2332_p8), %s2471_s15, 5  ;;  %s315_s13 = scalar_lea.sflag (!%p2332_p8), [#allocation3], %s2471_s15 }
  0x70   : > { %s2475_s20 = scalar_lea.vmem (!%p2332_p8), [#allocation2], %s1726_s16  ;;  %p2780_p7 = scmp.ne.s32.totalorder (!%p2332_p8), %s2766_s30, 0 }
  0x73   : > { %2205 = dma.done.wait (%p2780_p7), %s315_s13, 512  }
  0x74   : > { %2207 = vsyncadd (%p2780_p7), %s315_s13, 4294966784  ;;  %s323_s2 = sand.u32 1, %s2313_s28   ;;  %s1727_s9 = sshll.u32 %s2471_s15, 6 }
  0x75   : > { %s324_s12 = scalar_lea.sflag [#allocation6], %s323_s2  ;;  %s2485_s29 = scalar_lea.vmem [#allocation5], %s1727_s9 }
  0x76   : > { %2209 = dma.done.wait (%p2780_p7), %s324_s12, 1024  }
  0x77   : > { %2211 = vsyncadd (%p2780_p7), %s324_s12, 4294966272  ;;  %p2781_p8 = scmp.eq.s32.totalorder %s2313_s28, 0 }
  0x79   : > { %2213 = dma.done.wait (%p2781_p8), [#allocation6], 512   ;;  %p2782_p2 = pmov %p2781_p8 }
  0x7b   : > { %2215 = vsyncadd (%p2782_p2), [#allocation6], 4294966784  ;;  %p2783_p6 = pmov %p2782_p2 }
  0x7c   : > { %p2784_p12 = pmov %p2782_p2 }
  0x7d   : > { %2217 = dma.done.wait (%p2783_p6), [#allocation9], 512  }
  0x7e   : > { %2219 = vsyncadd (%p2784_p12), [#allocation9], 4294966784  ;;  %v602_v0 = vld [vmem:[%s2485_s29 + $0x8] sm:$0xff]  ;;  %v601_v1 = vld [vmem:[%s2485_s29] sm:$0xff]  ;;  %vm399_vm0 = vcmask 130048   ;;  %v2248_v57 = vmov 0  }
  0x7f   : > { %v1779_v2 = vld [vmem:[%s2475_s20] sm:$0xff]   ;;  %1853 = vmatprep.subr.mxu0 %v602_v0  ;;  %v604_v5 = vld [vmem:[%s2485_s29 + $0x18] sm:$0xff]  ;;  %v1794_v6 = vld [vmem:[%s2475_s20 + $0x8] sm:$0xff]   ;;  %2036 = vset.pattern.permute.xlu0 %v2248_v57  ;;  %vm943_vm1 = vcmask 261120   ;;  %s1731_s30 = sshll.u32 %s2313_s28, 2  ;;  %vm551_vm10 = vcmask 130112  }
  0x80   : > { %v2502_v3 = vunpack.c.l.bf16 %v1779_v2  ;;  %v2504_v4 = vunpack.c.h.bf16 %v1779_v2  ;;  %1854 = vmatpush3.msra.mxu0 %v602_v0  ;;  %1860 = vmatprep.subr.mxu1 %v604_v5  ;;  %v603_v7 = vld [vmem:[%s2485_s29 + $0x10] sm:$0xff]  ;;  %v2509_v8 = vunpack.c.l.bf16 %v1794_v6  ;;  %v2514_v10 = vunpack.c.h.bf16 %v1794_v6  ;;  %v606_v11 = vld [vmem:[%s2485_s29 + $0x28] sm:$0xff]  ;;  %v1796_v13 = vld [vmem:[%s2475_s20 + $0x18] sm:$0xff]   ;;  %p379_p0 = scmp.lt.s32.totalorder %s1731_s30, 7  ;;  %s368_s21 = scalar_lea.vmem [#allocation10], %s1727_s9 }
  0x81   : > { %v1795_v9 = vld [vmem:[%s2475_s20 + $0x10] sm:$0xff]   ;;  %1855 = vmatprep.subr.mxu0 %v601_v1  ;;  %1861 = vmatpush3.msra.mxu1 %v604_v5  ;;  %v605_v14 = vld [vmem:[%s2485_s29 + $0x20] sm:$0xff]  ;;  %v608_v15 = vld [vmem:[%s2485_s29 + $0x38] sm:$0xff]  ;;  %v2533_v18 = vunpack.c.l.bf16 %v1796_v13  ;;  %v2535_v19 = vunpack.c.h.bf16 %v1796_v13  ;;  %vm580_vm11 = vcmask 122880   ;;  %s1777_s26 = sshll.u32 %s2313_s28, 10  ;;  %s1573_s14 = sshll.u32 %s368_s21, 4  ;;  %s2702_s14 = int_to_ptr.vmem [resolvable:$true] %s1573_s14 }
  0x82   : > { %1857 = vmatprep.mubr.msk.f32.mxu0 %vm399_vm0, %v2502_v3  ;;  %1856 = vmatpush3.msra.mxu0 %v601_v1  ;;  %v2517_v12 = vunpack.c.l.bf16 %v1795_v9  ;;  %v2528_v16 = vunpack.c.h.bf16 %v1795_v9  ;;  %v607_v17 = vld [vmem:[%s2485_s29 + $0x30] sm:$0xff]  ;;  %v612_v20 = vld [vmem:[#allocation7 + $0x18] sm:$0xff]  ;;  %v610_v22 = vld [vmem:[#allocation7 + $0x8] sm:$0xff]  ;;  %v409_v24 = vsel %vm399_vm0, %v2514_v10, 0.0  ;;  %v403_v25 = vsel %vm399_vm0, %v2504_v4, 0.0  ;;  %s2794_s30 = smov (!%p379_p0, %s1731_s30), 7  ;;  %s2700_s20 = scalar_lea.hbm %s2754_s6, %s1777_s26 }
  0x83   : > { %1858 = vmatmul.mubr.msk.f32.vlgmr.msra.gmra.mxu0 %vm399_vm0, %v2504_v4  ;;  %1862 = vmatprep.subr.mxu1 %v603_v7  ;;  %v611_v21 = vld [vmem:[#allocation7 + $0x10] sm:$0xff]  ;;  %v609_v23 = vld [vmem:[#allocation7] sm:$0xff]  ;;  %v400_v26 = vsel %vm399_vm0, %v2502_v3, 0.0  ;;  %v406_v27 = vsel %vm399_vm0, %v2509_v8, 0.0  ;;  %v418_v35 = vsel %vm399_vm0, %v2533_v18, 0.0  ;;  %v421_v36 = vsel %vm399_vm0, %v2535_v19, 0.0  ;;  %s2607_s17 = scalar_lea.vmem %s2755_s7, %s2794_s30 }
  0x84   : > { %1863 = vmatpush3.msra.mxu1 %v603_v7  ;;  %1864 = vmatprep.mubr.msk.f32.mxu1 %vm399_vm0, %v2509_v8  ;;  %v424_v28 = vadd.f32 %v403_v25, %v400_v26  ;;  %v431_v29 = vadd.f32 %v409_v24, %v406_v27  ;;  %v412_v31 = vsel %vm399_vm0, %v2517_v12, 0.0  ;;  %v415_v32 = vsel %vm399_vm0, %v2528_v16, 0.0  ;;  %s1555_s28 = scalar_lea.sflag [#allocation4], %s2471_s15  ;;  %s2162_s2 = scalar_lea.vmem %s2702_s14, 1024 }
  0x85   : > { %1867 = vmatprep.subr.mxu0 %v606_v11  ;;  %1865 = vmatmul.mubr.msk.f32.vlgmr.msra.gmra.mxu1 %vm399_vm0, %v2514_v10  ;;  %v438_v37 = vadd.f32 %v415_v32, %v412_v31  ;;  %v445_v41 = vadd.f32 %v421_v36, %v418_v35  ;;  %p2163_p10 = scmp.ne.s32.totalorder %s2702_s14, %s2162_s2  ;;  %p2785_p3 = scmp.ne.s32.totalorder %s2772_s11, 0 }
  0x86   : > { %1868 = vmatpush3.msra.mxu0 %v606_v11  ;;  %1871 = vmatprep.mubr.msk.f32.mxu0 %vm399_vm0, %v2517_v12  ;;  %v425_v30 = vrot.slane %v424_v28, 4  ;;  %v432_v33 = vrot.slane %v431_v29, 4  ;;  %s2249_s9 = smov [#allocation10]  }
  0x87   : > { %1869 = vmatprep.subr.mxu0 %v605_v14  ;;  %1874 = vmatprep.subr.mxu1 %v608_v15  ;;  %v439_v40 = vrot.slane %v438_v37, 4  ;;  %v446_v45 = vrot.slane %v445_v41, 4  ;;  %p2164_p11 = pnand %p2163_p10, %p2785_p3  ;;  %s2166_s12 = sshll.u32 %s2249_s9, 4  ;;  %s2167_s12 = int_to_ptr.vmem [resolvable:$false] %s2166_s12 }
  0x88   : > { %1870 = vmatpush3.msra.mxu0 %v605_v14  ;;  %1875 = vmatpush3.msra.mxu1 %v608_v15  ;;  %v426_v34 = vadd.f32 %v425_v30, %v424_v28  ;;  %v433_v38 = vadd.f32 %v432_v33, %v431_v29  ;;  %s2168_s29 = scalar_lea.vmem %s2167_s12, 2048  ;;  %p2169_p13 = scmp.lt.s32.totalorder %s2702_s14, %s2167_s12 }
  0x89   : > { %1872 = vmatmul.mubr.msk.f32.vlgmr.msra.gmra.mxu0 %vm399_vm0, %v2528_v16  ;;  %1876 = vmatprep.subr.mxu1 %v607_v17  ;;  %v440_v44 = vadd.f32 %v439_v40, %v438_v37  ;;  %v447_v48 = vadd.f32 %v446_v45, %v445_v41  ;;  %v615_v45 = vld [vmem:[#allocation8 + $0x10] sm:$0xff]  ;;  %p2165_p9 = pneg %p2164_p11  ;;  %p2170_p1 = scmp.lt.s32.totalorder %s2168_s29, %s2162_s2 }
  0x8a   : > { %1877 = vmatpush3.msra.mxu1 %v607_v17  ;;  %1878 = vmatprep.mubr.msk.f32.mxu1 %vm399_vm0, %v2533_v18  ;;  %v427_v39 = vrot.slane %v426_v34, 2  ;;  %v434_v43 = vrot.slane %v433_v38, 2 }
  0x8b   : > { %1879 = vmatmul.mubr.msk.f32.vlgmr.msra.gmra.mxu1 %vm399_vm0, %v2535_v19  ;;  %1881 = vmatprep.subr.mxu0 %v612_v20  ;;  %v441_v49 = vrot.slane %v440_v44, 2  ;;  %v448_v53 = vrot.slane %v447_v48, 2  ;;  %p2171_p4 = por %p2170_p1, %p2169_p13 }
  0x8c   : > { %1882 = vmatpush3.msra.mxu0 %v612_v20  ;;  %1949 = vmatprep.subr.mxu1 %v612_v20  ;;  %v428_v42 = vadd.f32 %v427_v39, %v426_v34  ;;  %v435_v47 = vadd.f32 %v434_v43, %v433_v38 }
  0x8d   : > { %1883 = vmatprep.subr.mxu0 %v611_v21  ;;  %1953 = vmatpush3.msra.mxu1 %v612_v20  ;;  %v442_v52 = vadd.f32 %v441_v49, %v440_v44  ;;  %v449_v56 = vadd.f32 %v448_v53, %v447_v48  ;;  %v616_v44 = vld [vmem:[#allocation8 + $0x18] sm:$0xff]  ;;  %p2172_p5 = pnand %p2171_p4, %p2165_p9 }
  0x8e   : > { %1884 = vmatpush3.msra.mxu0 %v611_v21  ;;  %1950 = vmatprep.subr.mxu1 %v611_v21  ;;  %v429_v46 = vrot.slane %v428_v42, 1  ;;  %v436_v51 = vrot.slane %v435_v47, 1 }
  0x8f   : > { %1954 = vmatpush3.msra.mxu1 %v611_v21  ;;  %1885 = vmatprep.subr.mxu0 %v610_v22  ;;  %v443_v55 = vrot.slane %v442_v52, 1  ;;  %v450_v59 = vrot.slane %v449_v56, 1 }
  0x90   : > { %1951 = vmatprep.subr.mxu1 %v610_v22  ;;  %1886 = vmatpush3.msra.mxu0 %v610_v22  ;;  %v430_v50 = vadd.f32 %v429_v46, %v428_v42  ;;  %v437_v54 = vadd.f32 %v436_v51, %v435_v47  ;;  %v540_v46 = vlaneseq }
  0x91   : > { %1955 = vmatpush3.msra.mxu1 %v610_v22  ;;  %1887 = vmatprep.subr.mxu0 %v609_v23  ;;  %v444_v58 = vadd.f32 %v443_v55, %v442_v52  ;;  %v451_v60 = vadd.f32 %v450_v59, %v449_v56 }
  0x92   : > { %1952 = vmatprep.subr.mxu1 %v609_v23  ;;  %1888 = vmatpush3.msra.mxu0 %v609_v23  ;;  %v541_v47 = vand.u32 127, %v540_v46  ;;  %v543_v48 = vshrl.u32 %v540_v46, 7 }
  0x93   : > { %1956 = vmatpush3.msra.mxu1 %v609_v23  ;;  %410 = vadd.xlane.f32.xlu1 %v409_v24 }
  0x94   : > { %404 = vadd.xlane.f32.xlu0 %v403_v25  ;;  %2037 = vset.pattern.permute.xlu1 %v2248_v57  ;;  %v546_v49 = vadd.s32 4294967288, %v541_v47  ;;  %v544_v51 = vsub.s32 %v541_v47, %v543_v48 }
  0x95   : > { %1929 = vmatprep.subr.mxu0 %v616_v44 }
  0x97   : > { %407 = vadd.xlane.f32.xlu1 %v406_v27 }
  0x98   : > { %401 = vadd.xlane.f32.xlu0 %v400_v26 }
  0x9b   : > { %413 = vadd.xlane.f32.xlu1 %v412_v31 }
  0x9c   : > { %416 = vadd.xlane.f32.xlu0 %v415_v32 }
  0x9f   : > { %419 = vadd.xlane.f32.xlu1 %v418_v35 }
  0xa0   : > { %422 = vadd.xlane.f32.xlu0 %v421_v36 }
  0xb0   : > { %461 = vbcast.lane.b32.xlu1 %v430_v50, 264 }
  0xb4   : > { %464 = vbcast.lane.b32.xlu1 %v437_v54, 256 }
  0xb6   : > { %457 = vbcast.lane.b32.xlu0 %v430_v50, 256  ;;  %v549_v50 = vsub.s32 %v546_v49, %v543_v48 }
  0xb8   : > { %468 = vbcast.lane.b32.xlu1 %v437_v54, 264 }
  0xba   : > { %471 = vbcast.lane.b32.xlu0 %v444_v58, 256 }
  0xbc   : > { %475 = vbcast.lane.b32.xlu1 %v444_v58, 264 }
  0xbe   : > { %478 = vbcast.lane.b32.xlu0 %v451_v60, 256 }
  0xc0   : > { %482 = vbcast.lane.b32.xlu1 %v451_v60, 264 }
 0x11c   : > { %v2571_v7 = vpop.xlane.xlu1 %410 }
 0x11d   : > { %v2573_v9 = vpop.xlane.xlu0 %404 }
 0x11e   : > { %2038 = vrcp.f32 %v2573_v9 }
 0x120   : > { %v2575_v11 = vpop.xlane.xlu1 %407 }
 0x121   : > { %v2577_v13 = vpop.xlane.xlu0 %401 }
 0x122   : > { %2040 = vrcp.f32 %v2577_v13 }
 0x123   : > { %2042 = vrcp.f32 %v2571_v7 }
 0x124   : > { %v2579_v14 = vpop.xlane.xlu1 %413  ;;  %2044 = vrcp.f32 %v2575_v11 }
 0x125   : > { %v2581_v15 = vpop.xlane.xlu0 %416 }
 0x126   : > { %2046 = vrcp.f32 %v2581_v15 }
 0x127   : > { %2048 = vrcp.f32 %v2579_v14 }
 0x128   : > { %v2583_v17 = vpop.xlane.xlu1 %419 }
 0x129   : > { %v2585_v20 = vpop.xlane.xlu0 %422 }
 0x12a   : > { %2050 = vrcp.f32 %v2585_v20 }
 0x12b   : > { %2052 = vrcp.f32 %v2583_v17 }
 0x12c   : > { %v462_v21 = vpop.permute.xlu1 %461 }
 0x12d   : > { %v458_v22 = vpop.permute.xlu0 %457 }
 0x12e   : > { %v492_v23 = vadd.f32 %v458_v22, %v2577_v13 }
 0x130   : > { %vm500_vm3 = vcmp.eq.f32.partialorder %v492_v23, 2.0  ;;  %v465_v24 = vpop.permute.xlu1 %464 }
 0x131   : > { %v508_v26 = vsel %vm500_vm3, 1, %v2248_v57  ;;  %v494_v27 = vadd.f32 %v465_v24, %v2575_v11  ;;  %v472_v33 = vpop.permute.xlu0 %471 }
 0x132   : > { %517 = vperm.xlu0 %2036, %v508_v26   ;;  %v496_v35 = vadd.f32 %v472_v33, %v2579_v14 }
 0x133   : > { %vm502_vm4 = vcmp.eq.f32.partialorder %v494_v27, 2.0 }
 0x134   : > { %v469_v28 = vpop.permute.xlu1 %468  ;;  %v510_v29 = vsel %vm502_vm4, 1, %v2248_v57  ;;  %vm504_vm7 = vcmp.eq.f32.partialorder %v496_v35, 2.0 }
 0x135   : > { %v495_v30 = vadd.f32 %v469_v28, %v2571_v7  ;;  %v479_v37 = vpop.permute.xlu0 %478  ;;  %v512_v39 = vsel %vm504_vm7, 1, %v2248_v57 }
 0x136   : > { %v498_v41 = vadd.f32 %v479_v37, %v2583_v17 }
 0x137   : > { %vm503_vm5 = vcmp.eq.f32.partialorder %v495_v30, 2.0 }
 0x138   : > { %v511_v31 = vsel %vm503_vm5, 1, %v2248_v57  ;;  %v476_v32 = vpop.permute.xlu1 %475  ;;  %vm506_vm9 = vcmp.eq.f32.partialorder %v498_v41, 2.0 }
 0x139   : > { %526 = vperm.xlu0 %2036, %v511_v31   ;;  %v497_v34 = vadd.f32 %v476_v32, %v2581_v15  ;;  %v514_v43 = vsel %vm506_vm9, 1, %v2248_v57 }
 0x13b   : > { %vm505_vm6 = vcmp.eq.f32.partialorder %v497_v34, 2.0 }
 0x13c   : > { %v483_v36 = vpop.permute.xlu1 %482  ;;  %v513_v38 = vsel %vm505_vm6, 1, %v2248_v57 }
 0x13d   : > { %v499_v40 = vadd.f32 %v483_v36, %v2585_v20  ;;  %532 = vperm.xlu0 %2036, %v513_v38  }
 0x13f   : > { %vm507_vm8 = vcmp.eq.f32.partialorder %v499_v40, 2.0 }
 0x140   : > { %v515_v42 = vsel %vm507_vm8, 1, %v2248_v57 }
 0x141   : > { %538 = vperm.xlu0 %2036, %v515_v42  }
 0x143   : > { %v1859_v61 = vpop.f32.mrf.mxu0 }
 0x145   : > { %v691_v62 = vpop.f32.mrf.mxu0  ;;  %v1866_v63 = vpop.f32.mrf.mxu1 }
 0x146   : > { %1889 = vmatprep.mubr.msk.f32.mxu0 %vm943_vm1, %v691_v62  ;;  %v1748_v62 = vld [vmem:[%s2751_s3] ss:$0 sm:$0xff] }
 0x147   : > { %1890 = vmatmul.mubr.msk.f32.vlgmr.msra.gmra.mxu0 %vm943_vm1, %v1859_v61  ;;  %v772_v0 = vpop.f32.mrf.mxu1 }
 0x148   : > { %1892 = vmatprep.mubr.msk.f32.mxu0 %vm943_vm1, %v772_v0  ;;  %1930 = vmatpush3.msra.mxu0 %v616_v44 }
 0x149   : > { %v1873_v1 = vpop.f32.mrf.mxu0  ;;  %1931 = vmatprep.subr.mxu0 %v615_v45 }
 0x14a   : > { %1932 = vmatpush3.msra.mxu0 %v615_v45 }
 0x14b   : > { %1893 = vmatmul.mubr.msk.f32.gmra.mxu0 %vm943_vm1, %v1866_v63  ;;  %v853_v2 = vpop.f32.mrf.mxu0  ;;  %v1880_v5 = vpop.f32.mrf.mxu1 }
 0x14c   : > { %1895 = vmatprep.mubr.msk.f32.mxu1 %vm943_vm1, %v853_v2 }
 0x14d   : > { %1896 = vmatmul.mubr.msk.f32.vlgmr.msra.gmra.mxu1 %vm943_vm1, %v1873_v1  ;;  %v934_v6 = vpop.f32.mrf.mxu1 }
 0x14e   : > { %1898 = vmatprep.mubr.msk.f32.mxu1 %vm943_vm1, %v934_v6  ;;  %v2625_v6 = vpop.eup %2038 }
 0x14f   : > { %v2629_v11 = vpop.eup %2040 }
 0x150   : > { %v2634_v24 = vpop.eup %2042 }
 0x151   : > { %1899 = vmatmul.mubr.msk.f32.gmra.mxu1 %vm943_vm1, %v1880_v5  ;;  %v2637_v26 = vpop.eup %2044 }
 0x152   : > { %1905 = vmatprep.mubr.msk.f32.mxu1 %vm399_vm0, %v2502_v3  ;;  %v493_v3 = vadd.f32 %v462_v21, %v2573_v9  ;;  %v2643_v33 = vpop.eup %2046 }
 0x153   : > { %v2648_v37 = vpop.eup %2048 }
 0x154   : > { %vm501_vm2 = vcmp.eq.f32.partialorder %v493_v3, 2.0  ;;  %v2653_v41 = vpop.eup %2050 }
 0x155   : > { %v509_v25 = vsel %vm501_vm2, 1, %v2248_v57 }
 0x156   : > { %520 = vperm.xlu1 %2037, %v509_v25  }
 0x15a   : > { %523 = vperm.xlu1 %2037, %v510_v29  }
 0x15e   : > { %529 = vperm.xlu1 %2037, %v512_v39  }
 0x162   : > { %535 = vperm.xlu1 %2037, %v514_v43  }
 0x1ad   : > { %v518_v53 = vpop.permute.xlu0 %517 }
 0x1ae   : > { %v545_v55 = vrot.slane %v518_v53, %v544_v51 }
 0x1b4   : > { %v527_v59 = vpop.permute.xlu0 %526 }
 0x1b5   : > { %v560_v60 = vrot.slane %v527_v59, %v549_v50 }
 0x1b8   : > { %v533_v0 = vpop.permute.xlu0 %532 }
 0x1b9   : > { %v569_v2 = vrot.slane %v533_v0, %v549_v50 }
 0x1bc   : > { %v539_v22 = vpop.permute.xlu0 %538 }
 0x1bd   : > { %v578_v23 = vrot.slane %v539_v22, %v549_v50 }
 0x1d1   : > { %v521_v52 = vpop.permute.xlu1 %520 }
 0x1d2   : > { %v550_v54 = vrot.slane %v521_v52, %v549_v50 }
 0x1d4   : > { %v552_v56 = vsel %vm551_vm10, %v550_v54, %v545_v55 }
 0x1d5   : > { %581 = vst.msk [vmem:[%s2607_s17] sm:$0x1] %vm580_vm11, %v552_v56  ;;  %v524_v57 = vpop.permute.xlu1 %523 }
 0x1d6   : > { %v556_v58 = vrot.slane %v524_v57, %v544_v51 }
 0x1d8   : > { %v561_v61 = vsel %vm551_vm10, %v560_v60, %v556_v58 }
 0x1d9   : > { %582 = vst.msk [vmem:[%s2607_s17 + $0x1] sm:$0x1] %vm580_vm11, %v561_v61  ;;  %v530_v63 = vpop.permute.xlu1 %529 }
 0x1da   : > { %v565_v1 = vrot.slane %v530_v63, %v544_v51 }
 0x1dc   : > { %v570_v9 = vsel %vm551_vm10, %v569_v2, %v565_v1 }
 0x1dd   : > { %583 = vst.msk [vmem:[%s2607_s17 + $0x2] sm:$0x1] %vm580_vm11, %v570_v9  ;;  %v536_v14 = vpop.permute.xlu1 %535 }
 0x1de   : > { %v574_v20 = vrot.slane %v536_v14, %v544_v51  ;;  %v1765_v51 = vld [vmem:[%s2753_s5] ss:$0 sm:$0xff] }
 0x1e0   : > { %v579_v29 = vsel %vm551_vm10, %v578_v23, %v574_v20 }
 0x1e1   : > { %584 = vst.msk [vmem:[%s2607_s17 + $0x3] sm:$0x1] %vm580_vm11, %v579_v29 }
 0x207   : > { %v1891_v5 = vpop.f32.mrf.mxu0 }
 0x208   : > { %v1080_v7 = vadd.f32 %v1891_v5, %v1748_v62 }
 0x209   : > { %v1034_v13 = vpop.f32.mrf.mxu0 }
 0x20a   : > { %v1088_v15 = vmul.f32 %v2625_v6, %v1080_v7  ;;  %v1079_v21 = vadd.f32 %v1748_v62, %v1034_v13 }
 0x20b   : > { %v1894_v3 = vpop.f32.mrf.mxu0 }
 0x20c   : > { %v1087_v17 = vmul.f32 %v2629_v11, %v1079_v21  ;;  %v1082_v25 = vadd.f32 %v1894_v3, %v1748_v62  ;;  %1901 = vmatprep.subr.mxu1 %v1088_v15 }
 0x20d   : > { %v1044_v27 = vpop.f32.mrf.mxu0  ;;  %1902 = vmatpush3.msra.mxu1 %v1088_v15  ;;  %v1897_v28 = vpop.f32.mrf.mxu1 }
 0x20e   : > { %v1090_v30 = vmul.f32 %v2634_v24, %v1082_v25  ;;  %v1081_v31 = vadd.f32 %v1748_v62, %v1044_v27  ;;  %v1084_v32 = vadd.f32 %v1897_v28, %v1748_v62  ;;  %1903 = vmatprep.subr.mxu1 %v1087_v17 }
 0x20f   : > { %1904 = vmatpush3.msra.mxu1 %v1087_v17  ;;  %v1054_v34 = vpop.f32.mrf.mxu1 }
 0x210   : > { %v1089_v35 = vmul.f32 %v2637_v26, %v1081_v31  ;;  %v1083_v36 = vadd.f32 %v1748_v62, %v1054_v34  ;;  %1906 = vmatmul.mubr.msk.f32.vlgmr.msra.gmra.mxu1 %vm399_vm0, %v2504_v4  ;;  %1908 = vmatprep.subr.mxu1 %v1090_v30  ;;  %v1092_v39 = vmul.f32 %v2643_v33, %v1084_v32  ;;  %v2658_v4 = vpop.eup %2052 }
 0x211   : > { %1909 = vmatpush3.msra.mxu1 %v1090_v30  ;;  %v1900_v38 = vpop.f32.mrf.mxu1  ;;  %1912 = vmatprep.mubr.msk.f32.mxu1 %vm399_vm0, %v2509_v8 }
 0x212   : > { %v1086_v40 = vadd.f32 %v1900_v38, %v1748_v62  ;;  %1910 = vmatprep.subr.mxu1 %v1089_v35  ;;  %v1091_v43 = vmul.f32 %v2648_v37, %v1083_v36 }
 0x213   : > { %1911 = vmatpush3.msra.mxu1 %v1089_v35  ;;  %v1064_v42 = vpop.f32.mrf.mxu1 }
 0x214   : > { %v1085_v44 = vadd.f32 %v1748_v62, %v1064_v42  ;;  %1913 = vmatmul.mubr.msk.f32.vlgmr.msra.gmra.mxu1 %vm399_vm0, %v2514_v10  ;;  %1915 = vmatprep.subr.mxu1 %v1092_v39  ;;  %v1094_v8 = vmul.f32 %v2653_v41, %v1086_v40  ;;  %v614_v10 = vld [vmem:[#allocation8 + $0x8] sm:$0xff] }
 0x215   : > { %1916 = vmatpush3.msra.mxu1 %v1092_v39  ;;  %1919 = vmatprep.mubr.msk.f32.mxu1 %vm399_vm0, %v2517_v12  ;;  %v613_v12 = vld [vmem:[#allocation8] sm:$0xff] }
 0x216   : > { %1917 = vmatprep.subr.mxu1 %v1091_v43  ;;  %v1093_v45 = vmul.f32 %v2658_v4, %v1085_v44  ;;  %1933 = vmatprep.subr.mxu0 %v614_v10 }
 0x217   : > { %1918 = vmatpush3.msra.mxu1 %v1091_v43  ;;  %1934 = vmatpush3.msra.mxu0 %v614_v10 }
 0x218   : > { %1920 = vmatmul.mubr.msk.f32.vlgmr.msra.gmra.mxu1 %vm399_vm0, %v2528_v16  ;;  %1922 = vmatprep.subr.mxu1 %v1094_v8 }
 0x219   : > { %1923 = vmatpush3.msra.mxu1 %v1094_v8  ;;  %1926 = vmatprep.mubr.msk.f32.mxu1 %vm399_vm0, %v2533_v18 }
 0x21a   : > { %1924 = vmatprep.subr.mxu1 %v1093_v45  ;;  %1935 = vmatprep.subr.mxu0 %v613_v12 }
 0x21b   : > { %1925 = vmatpush3.msra.mxu1 %v1093_v45  ;;  %1936 = vmatpush3.msra.mxu0 %v613_v12 }
 0x21c   : > { %1927 = vmatmul.mubr.msk.f32.vlgmr.msra.gmra.mxu1 %vm399_vm0, %v2535_v19 }
 0x2d0   : > { %v1907_v46 = vpop.f32.mrf.mxu1 }
 0x2d2   : > { %v1161_v47 = vpop.f32.mrf.mxu1 }
 0x2d3   : > { %1937 = vmatprep.mubr.msk.f32.mxu0 %vm943_vm1, %v1161_v47 }
 0x2d4   : > { %v1914_v16 = vpop.f32.mrf.mxu1  ;;  %1938 = vmatmul.mubr.msk.f32.vlgmr.msra.gmra.mxu0 %vm943_vm1, %v1907_v46 }
 0x2d6   : > { %v1236_v48 = vpop.f32.mrf.mxu1 }
 0x2d7   : > { %1940 = vmatprep.mubr.msk.f32.mxu0 %vm943_vm1, %v1236_v48 }
 0x2d8   : > { %v1921_v18 = vpop.f32.mrf.mxu1  ;;  %1941 = vmatmul.mubr.msk.f32.gmra.mxu0 %vm943_vm1, %v1914_v16 }
 0x2da   : > { %v1311_v19 = vpop.f32.mrf.mxu1 }
 0x2db   : > { %1943 = vmatprep.mubr.msk.f32.mxu0 %vm943_vm1, %v1311_v19 }
 0x2dc   : > { %v1928_v49 = vpop.f32.mrf.mxu1  ;;  %1944 = vmatmul.mubr.msk.f32.gmra.mxu0 %vm943_vm1, %v1921_v18 }
 0x2de   : > { %v1386_v50 = vpop.f32.mrf.mxu1 }
 0x2df   : > { %1946 = vmatprep.mubr.msk.f32.mxu0 %vm943_vm1, %v1386_v50 }
 0x2e0   : > { %1947 = vmatmul.mubr.msk.f32.gmra.mxu0 %vm943_vm1, %v1928_v49 }
 0x394   : > { %v1939_v52 = vpop.f32.mrf.mxu0 }
 0x395   : > { %v1531_v53 = vadd.f32 %v1939_v52, %v1765_v51 }
 0x396   : > { %v1485_v54 = vpop.f32.mrf.mxu0 }
 0x397   : > { %v1539_v55 = vmul.f32 %v2625_v6, %v1531_v53  ;;  %v1530_v56 = vadd.f32 %v1765_v51, %v1485_v54 }
 0x398   : > { %v1942_v57 = vpop.f32.mrf.mxu0 }
 0x399   : > { %1547 = vst.msk [vmem:[%s368_s21 + $0x8] sm:$0xff] %vm943_vm1, %v1539_v55  ;;  %v1538_v58 = vmul.f32 %v2629_v11, %v1530_v56  ;;  %v1533_v59 = vadd.f32 %v1942_v57, %v1765_v51 }
 0x39a   : > { %v1495_v60 = vpop.f32.mrf.mxu0 }
 0x39b   : > { %1546 = vst.msk [vmem:[%s368_s21] sm:$0xff] %vm943_vm1, %v1538_v58  ;;  %v1541_v61 = vmul.f32 %v2634_v24, %v1533_v59  ;;  %v1532_v62 = vadd.f32 %v1765_v51, %v1495_v60 }
 0x39c   : > { %v1945_v63 = vpop.f32.mrf.mxu0 }
 0x39d   : > { %1549 = vst.msk [vmem:[%s368_s21 + $0x18] sm:$0xff] %vm943_vm1, %v1541_v61  ;;  %v1540_v0 = vmul.f32 %v2637_v26, %v1532_v62  ;;  %v1535_v1 = vadd.f32 %v1945_v63, %v1765_v51 }
 0x39e   : > { %v1505_v2 = vpop.f32.mrf.mxu0 }
 0x39f   : > { %1548 = vst.msk [vmem:[%s368_s21 + $0x10] sm:$0xff] %vm943_vm1, %v1540_v0  ;;  %v1543_v5 = vmul.f32 %v2643_v33, %v1535_v1  ;;  %v1534_v6 = vadd.f32 %v1765_v51, %v1505_v2 }
 0x3a0   : > { %v1948_v7 = vpop.f32.mrf.mxu0 }
 0x3a1   : > { %1551 = vst.msk [vmem:[%s368_s21 + $0x28] sm:$0xff] %vm943_vm1, %v1543_v5  ;;  %v1542_v9 = vmul.f32 %v2648_v37, %v1534_v6  ;;  %v1537_v11 = vadd.f32 %v1948_v7, %v1765_v51 }
 0x3a2   : > { %v1515_v13 = vpop.f32.mrf.mxu0 }
 0x3a3   : > { %1550 = vst.msk [vmem:[%s368_s21 + $0x20] sm:$0xff] %vm943_vm1, %v1542_v9  ;;  %v1545_v14 = vmul.f32 %v2653_v41, %v1537_v11  ;;  %v1536_v15 = vadd.f32 %v1765_v51, %v1515_v13 }
 0x3a5   : > { %1553 = vst.msk [vmem:[%s368_s21 + $0x38] sm:$0xff] %vm943_vm1, %v1545_v14  ;;  %v1544_v21 = vmul.f32 %v2658_v4, %v1536_v15 }
 0x3a7   : > { %1552 = vst.msk [vmem:[%s368_s21 + $0x30] sm:$0xff] %vm943_vm1, %v1544_v21 }
 0x3a8   : > { %2175 = shalt.err (!%p2172_p5)
}
 0x3a9   : > { %s2176_s30 = scalar_lea.hbm %s2700_s20, 1024  ;;  %s2180_s17 = scalar_lea.hbm %s2754_s6, 2048 }
 0x3aa   : > { %p2177_p7 = scmp.ne.s32.totalorder %s2700_s20, %s2176_s30  ;;  %p2181_p6 = scmp.lt.s32.totalorder %s2700_s20, %s2754_s6 }
 0x3ab   : > { %p2182_p12 = scmp.lt.s32.totalorder %s2180_s17, %s2176_s30 }
 0x3ac   : > { %p2178_p8 = pnand %p2177_p7, %p2785_p3 }
 0x3ad   : > { %p2183_p0 = por %p2182_p12, %p2181_p6 }
 0x3ae   : > { %p2179_p2 = pneg %p2178_p8 }
 0x3b0   : > { %p2184_p10 = pnand %p2183_p0, %p2179_p2 }
 0x3b2   : > { %2187 = shalt.err (!%p2184_p10)
}
 0x3b3   : > { %s2250_s4 = smov 128   ;;  %s2251_s19 = smov 8  }
 0x3b4   : > { %1969 = dma.vmem_to_hbm [thread:$0]  (%p2785_p3), %s2702_s14, 1024, %s2700_s20, %s1555_s28, %s2250_s4, %s2250_s4, %s2251_s19  }
 0x3b5 PF: > { %s1592_s21 = sand.u32 1, %s2226_s24   ;;  %p2786_p11 = scmp.ne.s32.totalorder %s2767_s8, 0 }
 0x3b6   : > { %p2787_p9 = scmp.ge.s32.totalorder %s2238_s27, 2  ;;  %s1593_s26 = scalar_lea.sflag [#allocation4], %s1592_s21 }
 0x3b8   : > { %p1986_p13 = pnand %p2787_p9, %p2786_p11 }
 0x3ba   : > { %p1987_p1 = pneg %p1986_p13 }
 0x3bc   : > { %2221 = dma.done.wait (%p1987_p1), %s1593_s26, 1024  }
 0x3bd   : > { %2223 = vsyncadd (%p1987_p1), %s1593_s26, 4294966272  ;;  %s2788_s16 = sld [smem:[#allocation16_spill]]  ;;  %p25_p4 = scmp.ge.s32.totalorder %s2370_s23, 4  }
 0x3be   : > { %s2789_s26 = sld [smem:[#allocation17_spill]]  ;;  %s2790_s24 = smov %s2230_s25 }
 0x3bf   : > { %s2792_s27 = smov %s2370_s23  ;;  %27 = sbr.rel (!%p25_p4) target bundleno = 12 (0xc), region = 122 }
 0x3c3   : > { %s2791_s25 = smov %s2788_s16 }
 0x3c4   :  { %1605 = vsyncpa [#allocation3], 1 }
 0x3c5   :  { %1607 = vsyncpa [#allocation3 + $0x1], 1 }
 0x3c6   :  { %1608 = vsyncpa [#allocation6], 1 }
 0x3c7   :  { %1610 = vsyncpa [#allocation6 + $0x1], 1 }
 0x3c8   :  { %1611 = vsyncpa [#allocation9], 1 }
 0x3c9   :  { %1612 = vsyncpa [#allocation4], 1 }
 0x3ca   :  { %1614 = vsyncpa [#allocation4 + $0x1], 1 }

</bundles_post_ra>
